<compile_context>
chip_gen: v7x
topology: tpu7x:2x2x1
jax: 0.10.0
libtpu: 0.0.40
codegen_flags: <defaults>
</compile_context>

<pallas_src>
import functools

import jax
import jax.numpy as jnp
import numpy as np
from jax.experimental import pallas as pl
from jax.experimental.pallas import tpu as pltpu


def _split_episode_kernel(shot_cols, f_ref, sup_ref, qry_ref):
    # f_ref block: (E_blk, W, (S+Q)*D), lane-folded.  The split point shot_cols
    # = S*D is a static, typically 128-aligned lane offset, so both stores are
    # dense full-tile writes.
    sup_ref[...] = f_ref[:, :, :shot_cols]
    qry_ref[...] = f_ref[:, :, shot_cols:]


def _round_up(n, m):
    return -(-n // m) * m


def _hw_params():
    """(min_grid_steps, vmem_limit_bytes), generation-aware with safe fallback."""
    vmem_capacity = 128 << 20
    try:
        info = pltpu.get_tpu_info()
        vmem_capacity = int(getattr(info, "vmem_capacity_bytes", vmem_capacity))
    except Exception:
        pass
    if vmem_capacity <= (96 << 20):
        # v7x-class: 64 MiB VMEM per TensorCore, 2 TensorCores per chip.
        # Require >=4 grid steps so each core still gets >=2 pipelined steps,
        # and keep the scoped VMEM limit well under the halved capacity.
        return 4, (32 << 20)
    # v5e/v6e-class: 128 MiB VMEM, single TensorCore -> prefer big blocks.
    return 1, (48 << 20)


def _choose_episode_block(episode_size, step_bytes_per_episode, budget_bytes,
                          min_steps):
    """Largest divisor of episode_size whose per-step (padded, double-buffered)
    footprint fits the budget, preferring to leave >= min_steps grid steps."""
    divisors = [d for d in range(1, episode_size + 1) if episode_size % d == 0]
    fitting = [d for d in divisors if d * step_bytes_per_episode <= budget_bytes]
    if not fitting:
        # TODO(synk): a single episode exceeding the VMEM budget would need an
        # extra grid axis tiling the (S+Q)*D lane dimension; clamp to 1 here.
        fitting = [1]
    multi_step = [d for d in fitting if episode_size // d >= min_steps]
    return max(multi_step) if multi_step else max(fitting)


def split_by_episode_mode1(features, way_num, shot_num, query_num, *,
                           use_pallas=None):
    """Pallas version of AbstractModel.split_by_episode(features, mode=1)."""
    total_rows, feat_dim = features.shape
    sq = shot_num + query_num
    per_episode = way_num * sq
    assert total_rows % per_episode == 0, (
        "features rows must be a multiple of way*(shot+query)")
    episode_size = total_rows // per_episode
    itemsize = jnp.dtype(features.dtype).itemsize

    in_cols = sq * feat_dim
    shot_cols = shot_num * feat_dim
    query_cols = query_num * feat_dim

    if use_pallas is None:
        # Zero-FLOP copy: for tiny inputs XLA's fused slice/reshape beats the
        # fixed pallas_call launch + per-step overhead.
        use_pallas = (2 * total_rows * feat_dim * itemsize) >= (2 << 20)

    if use_pallas:
        # Lane-folded glue reshape (pure row-major view): (E*W*(S+Q), D) -> (E, W, (S+Q)*D)
        f = features.reshape(episode_size, way_num, in_cols)

        # Padded, double-buffered VMEM footprint per episode per grid step:
        # sublane axis W pads to a multiple of 8, lane axes pad to 128.
        w_pad = _round_up(way_num, 8)
        padded_cols = (_round_up(in_cols, 128) + _round_up(shot_cols, 128)
                       + _round_up(query_cols, 128))
        step_bytes_per_episode = 2 * w_pad * padded_cols * itemsize

        min_steps, vmem_limit = _hw_params()
        budget = (vmem_limit * 3) // 4  # headroom under the scoped limit
        e_blk = _choose_episode_block(episode_size, step_bytes_per_episode,
                                      budget, min_steps)

        kernel = functools.partial(_split_episode_kernel, shot_cols)
        sup3, qry3 = pl.pallas_call(
            kernel,
            out_shape=(
                jax.ShapeDtypeStruct((episode_size, way_num, shot_cols),
                                     features.dtype),
                jax.ShapeDtypeStruct((episode_size, way_num, query_cols),
                                     features.dtype),
            ),
            grid=(episode_size // e_blk,),
            in_specs=[
                # last two block dims equal the full array dims -> (8,128) rule ok
                pl.BlockSpec((e_blk, way_num, in_cols), lambda e: (e, 0, 0)),
            ],
            out_specs=(
                pl.BlockSpec((e_blk, way_num, shot_cols), lambda e: (e, 0, 0)),
                pl.BlockSpec((e_blk, way_num, query_cols), lambda e: (e, 0, 0)),
            ),
            compiler_params=pltpu.CompilerParams(
                dimension_semantics=("parallel",),
                vmem_limit_bytes=vmem_limit),
        )(f)

        # Free row-major views back to the reference shapes.
        support_features = sup3.reshape(episode_size, way_num * shot_num, feat_dim)
        query_features = qry3.reshape(episode_size, way_num * query_num, feat_dim)
    else:
        f = features.reshape(episode_size, way_num, sq, feat_dim)
        support_features = f[:, :, :shot_num, :].reshape(
            episode_size, way_num * shot_num, feat_dim)
        query_features = f[:, :, shot_num:, :].reshape(
            episode_size, way_num * query_num, feat_dim)

    # Local targets are data-independent compile-time constants: build them in
    # the wrapper (folded by XLA) instead of emitting lane-sparse kernel stores.
    base = jnp.arange(way_num, dtype=jnp.int32)
    support_target = jnp.broadcast_to(
        jnp.repeat(base, shot_num)[None, :], (episode_size, way_num * shot_num))
    query_target = jnp.broadcast_to(
        jnp.repeat(base, query_num)[None, :], (episode_size, way_num * query_num))

    return support_features, query_features, support_target, query_target


class AbstractModelPallas:
    """Mirrors AbstractModel's forward-dispatch semantics around the Pallas kernel."""

    def __init__(self, init_type="normal", model_type="ABSTRACT",
                 way_num=4, shot_num=2, query_num=3, **kwargs):
        self.init_type = init_type
        self.model_type = model_type
        self.way_num = way_num
        self.shot_num = shot_num
        self.query_num = query_num
        self.training = False
        for key, value in kwargs.items():
            setattr(self, key, value)

    def train(self, mode=True):
        self.training = mode
        return self

    def eval(self):
        return self.train(False)

    def set_forward(self, x):
        # x is (embedded_features, global_labels); only the features carry compute.
        features, _global_labels = x
        return split_by_episode_mode1(
            features, self.way_num, self.shot_num, self.query_num,
            use_pallas=getattr(self, "use_pallas", None))

    def set_forward_loss(self, x):
        # TODO(synk): set_forward_loss is abstract in the reference (no loss head
        # defined); fall back to the same episode split so the training branch runs.
        return self.set_forward(x)

    def forward(self, x):
        if isinstance(x, (list, tuple)) and len(x) > 2:
            x = x[:2]
        if self.training:
            return self.set_forward_loss(x)
        return self.set_forward(x)

    __call__ = forward


if __name__ == "__main__":
    # deterministic small problem: 4 episodes, 4-way, 2-shot, 3-query, 128-d features
    way_num, shot_num, query_num, episode_size, feat_dim = 4, 2, 3, 4, 128
    total = episode_size * way_num * (shot_num + query_num)

    key = jax.random.PRNGKey(0)
    k_feat, k_lab = jax.random.split(key)
    features = jax.random.normal(k_feat, (total, feat_dim), dtype=jnp.float32)
    global_labels = jax.random.randint(k_lab, (total,), 0, 64, dtype=jnp.int32)

    # use_pallas=True forces the Pallas path (the input is small enough that the
    # auto heuristic would otherwise take the plain-XLA fast path).
    model = AbstractModelPallas(init_type="normal", way_num=way_num,
                                shot_num=shot_num, query_num=query_num,
                                device="tpu", use_pallas=True)
    model.eval()

    # tuple longer than 2 to exercise the `x = x[:2]` truncation in forward()
    out = model((features, global_labels, "extra_unused"))
    out = jax.block_until_ready(out)
    support_features, query_features, support_target, query_target = out

    # reference check in plain numpy
    f_np = np.asarray(features).reshape(
        episode_size, way_num, shot_num + query_num, feat_dim)
    sup_ref = f_np[:, :, :shot_num, :].reshape(
        episode_size, way_num * shot_num, feat_dim)
    qry_ref = f_np[:, :, shot_num:, :].reshape(
        episode_size, way_num * query_num, feat_dim)
    t_np = np.arange(way_num, dtype=np.int32).reshape(1, -1, 1)
    t_np = np.tile(t_np, (episode_size, 1, shot_num + query_num))
    sup_t_ref = t_np[:, :, :shot_num].reshape(episode_size, way_num * shot_num)
    qry_t_ref = t_np[:, :, shot_num:].reshape(episode_size, way_num * query_num)

    np.testing.assert_allclose(np.asarray(support_features), sup_ref, rtol=0, atol=0)
    np.testing.assert_allclose(np.asarray(query_features), qry_ref, rtol=0, atol=0)
    np.testing.assert_array_equal(np.asarray(support_target), sup_t_ref)
    np.testing.assert_array_equal(np.asarray(query_target), qry_t_ref)

    print("KERNEL_OK")
</pallas_src>

<mosaic_0001>
module attributes {stable_mosaic.version = 11 : i64} {
  func.func @_split_episode_kernel(%arg0: i32, %arg1: memref<4x4x640xf32, #tpu.memory_space<vmem>>, %arg2: memref<4x4x256xf32, #tpu.memory_space<vmem>>, %arg3: memref<4x4x384xf32, #tpu.memory_space<vmem>>) attributes {dimension_semantics = [#tpu.dimension_semantics<parallel>], iteration_bounds = array<i64: 1>, scalar_prefetch = 0 : i64, scratch_operands = 0 : i64, tpu.core_type = #tpu.core_type<tc>, window_params = [{transform_indices = @transform_0, window_bounds = array<i64: 4, 4, 640>}, {transform_indices = @transform_1, window_bounds = array<i64: 4, 4, 256>}, {transform_indices = @transform_2, window_bounds = array<i64: 4, 4, 384>}]} {
    %c0 = arith.constant 0 : index
    %c0_0 = arith.constant 0 : index
    %c0_1 = arith.constant 0 : index
    %0 = vector.load %arg1[%c0, %c0_0, %c0_1] : memref<4x4x640xf32, #tpu.memory_space<vmem>>, vector<4x4x256xf32>
    %c0_2 = arith.constant 0 : index
    %c0_3 = arith.constant 0 : index
    %c0_4 = arith.constant 0 : index
    %1 = vector.load %arg2[%c0_2, %c0_3, %c0_4] : memref<4x4x256xf32, #tpu.memory_space<vmem>>, vector<4x4x256xf32>
    tpu.vector_store %arg2[%c0_2, %c0_3, %c0_4], %0 {strides = array<i32>} : memref<4x4x256xf32, #tpu.memory_space<vmem>>, vector<4x4x256xf32>,
    %c0_5 = arith.constant 0 : index
    %c0_6 = arith.constant 0 : index
    %c256 = arith.constant 256 : index
    %2 = vector.load %arg1[%c0_5, %c0_6, %c256] : memref<4x4x640xf32, #tpu.memory_space<vmem>>, vector<4x4x384xf32>
    %c0_7 = arith.constant 0 : index
    %c0_8 = arith.constant 0 : index
    %c0_9 = arith.constant 0 : index
    %3 = vector.load %arg3[%c0_7, %c0_8, %c0_9] : memref<4x4x384xf32, #tpu.memory_space<vmem>>, vector<4x4x384xf32>
    tpu.vector_store %arg3[%c0_7, %c0_8, %c0_9], %2 {strides = array<i32>} : memref<4x4x384xf32, #tpu.memory_space<vmem>>, vector<4x4x384xf32>,
    return
  }
  func.func @transform_0(%arg0: i32) -> (i32, i32, i32) {
    %c0_i32 = arith.constant 0 : i32
    %c0_i32_0 = arith.constant 0 : i32
    %c0_i32_1 = arith.constant 0 : i32
    return %arg0, %c0_i32, %c0_i32_0 : i32, i32, i32
  }
  func.func @transform_1(%arg0: i32) -> (i32, i32, i32) {
    %c0_i32 = arith.constant 0 : i32
    %c0_i32_0 = arith.constant 0 : i32
    %c0_i32_1 = arith.constant 0 : i32
    return %arg0, %c0_i32, %c0_i32_0 : i32, i32, i32
  }
  func.func @transform_2(%arg0: i32) -> (i32, i32, i32) {
    %c0_i32 = arith.constant 0 : i32
    %c0_i32_0 = arith.constant 0 : i32
    %c0_i32_1 = arith.constant 0 : i32
    return %arg0, %c0_i32, %c0_i32_0 : i32, i32, i32
  }
}

</mosaic_0001>

<bundles_post_ra>
// kernel: tpu_custom_call.1
= control target key start
LH: loop header
LB: loop body
LE: loop exit
PB: predicated region body
PF: predicated region fallthrough
CT: control target
= control target key end

     0   :  { %8 = vsyncpa [#allocation3], 0  ;;  %s238_s0 = inlined_call_operand.hbm [shape: f32[4,4,640], index: 0, kind: input, shape index: {}]   ;;  %s239_s1 = inlined_call_operand.hbm [shape: f32[4,4,256], index: 1, kind: output, shape index: {0}]   ;;  %s240_s2 = inlined_call_operand.hbm [shape: f32[4,4,384], index: 2, kind: output, shape index: {1}]  }
   0x1   :  { %9 = vsyncpa [#allocation4], 0 }
   0x2   :  { %10 = vsyncpa [#allocation7], 0  ;;  %s164_s9 = smov [#allocation2]   ;;  %s92_s13 = scalar_lea.hbm %s238_s0, 1280 }
   0x3   :  { %s16_s10 = sshll.u32 %s164_s9, 4  ;;  %p93_p0 = scmp.ne.s32.totalorder %s238_s0, %s92_s13  ;;  %s17_s10 = int_to_ptr.vmem [resolvable:$true] %s16_s10 }
   0x4   :  { %p96_p1 = scmp.lt.u32.totalorder %s92_s13, %s238_s0 }
   0x6   :  { %p98_p2 = pnand %p96_p1, %p93_p0 }
   0x8   :  { %101 = shalt.err (!%p98_p2)
}
   0x9   :  { %s102_s18 = scalar_lea.vmem %s17_s10, 1280  ;;  %p107_p4 = scmp.lt.s32.totalorder %s17_s10, %s17_s10 }
   0xa   :  { %p103_p3 = scmp.ne.s32.totalorder %s17_s10, %s102_s18  ;;  %p108_p5 = scmp.lt.s32.totalorder %s102_s18, %s102_s18 }
   0xc   :  { %p109_p6 = por %p108_p5, %p107_p4 }
   0xe   :  { %p110_p7 = pnand %p109_p6, %p103_p3 }
  0x10   :  { %113 = shalt.err (!%p110_p7)
}
  0x11   :  { %s165_s19 = smov 320   ;;  %s166_s20 = smov 20  }
  0x12   :  { %22 = dma.hbm_to_vmem [thread:$0]  %s238_s0, 1280, %s17_s10, [#allocation3], %s165_s19, %s165_s19, %s166_s20  }
  0x13   :  { %158 = dma.done.wait [#allocation3], 1280  }
  0x14   :  { %159 = vsyncadd [#allocation3], 4294966016  ;;  %s167_s23 = smov [#allocation5]   ;;  %s168_s25 = smov [#allocation6]   ;;  %v26_v0 = vld [vmem:[#allocation2] sm:$0xff]  ;;  %v27_v1 = vld [vmem:[#allocation2 + $0x14] sm:$0xff] }
  0x15   :  { %s55_s24 = sshll.u32 %s167_s23, 4  ;;  %s67_s26 = sshll.u32 %s168_s25, 4  ;;  %v28_v2 = vld [vmem:[#allocation2 + $0x28] sm:$0xff]  ;;  %30 = vst [vmem:[#allocation5] sm:$0xff] %v26_v0  ;;  %31 = vst [vmem:[#allocation5 + $0x8] sm:$0xff] %v27_v1  ;;  %v29_v3 = vld [vmem:[#allocation2 + $0x3c] sm:$0xff]  ;;  %s200_s24 = int_to_ptr.vmem [resolvable:$true] %s55_s24  ;;  %s202_s26 = int_to_ptr.vmem [resolvable:$true] %s67_s26 }
  0x16   :  { %32 = vst [vmem:[#allocation5 + $0x10] sm:$0xff] %v28_v2  ;;  %v34_v4 = vld [vmem:[#allocation2 + $0x8] sm:$0xff]  ;;  %v35_v5 = vld [vmem:[#allocation2 + $0x10] sm:$0xf]  ;;  %33 = vst [vmem:[#allocation5 + $0x18] sm:$0xff] %v29_v3  ;;  %s114_s0 = scalar_lea.vmem %s200_s24, 512  ;;  %p119_p9 = scmp.lt.s32.totalorder %s200_s24, %s200_s24 }
  0x17   :  { %42 = vst [vmem:[#allocation6] sm:$0xff] %v34_v4  ;;  %43 = vst [vmem:[#allocation6 + $0x8] sm:$0xf] %v35_v5  ;;  %v36_v6 = vld [vmem:[#allocation2 + $0x1c] sm:$0xff]  ;;  %v37_v7 = vld [vmem:[#allocation2 + $0x24] sm:$0xf]  ;;  %p115_p8 = scmp.ne.s32.totalorder %s200_s24, %s114_s0  ;;  %p120_p10 = scmp.lt.s32.totalorder %s114_s0, %s114_s0 }
  0x18   :  { %v38_v8 = vld [vmem:[#allocation2 + $0x30] sm:$0xff]  ;;  %44 = vst [vmem:[#allocation6 + $0xc] sm:$0xff] %v36_v6  ;;  %45 = vst [vmem:[#allocation6 + $0x14] sm:$0xf] %v37_v7  ;;  %v39_v9 = vld [vmem:[#allocation2 + $0x38] sm:$0xf] }
  0x19   :  { %46 = vst [vmem:[#allocation6 + $0x18] sm:$0xff] %v38_v8  ;;  %v40_v10 = vld [vmem:[#allocation2 + $0x44] sm:$0xff]  ;;  %v41_v11 = vld [vmem:[#allocation2 + $0x4c] sm:$0xf]  ;;  %47 = vst [vmem:[#allocation6 + $0x20] sm:$0xf] %v39_v9  ;;  %p121_p11 = por %p120_p10, %p119_p9 }
  0x1a   :  { %48 = vst [vmem:[#allocation6 + $0x24] sm:$0xff] %v40_v10  ;;  %49 = vst [vmem:[#allocation6 + $0x2c] sm:$0xf] %v41_v11 }
  0x1b   :  { %p122_p12 = pnand %p121_p11, %p115_p8 }
  0x1d   :  { %125 = shalt.err (!%p122_p12)
}
  0x1e   :  { %s126_s29 = scalar_lea.hbm %s239_s1, 512 }
  0x1f   :  { %p127_p13 = scmp.ne.s32.totalorder %s239_s1, %s126_s29  ;;  %p130_p0 = scmp.lt.u32.totalorder %s126_s29, %s239_s1 }
  0x21   :  { %p132_p1 = pnand %p130_p0, %p127_p13 }
  0x23   :  { %135 = shalt.err (!%p132_p1)
}
  0x24   :  { %s169_s6 = smov 128   ;;  %s170_s7 = smov 8  }
  0x25   :  { %61 = dma.vmem_to_hbm [thread:$0]  %s200_s24, 512, %s239_s1, [#allocation4], %s169_s6, %s169_s6, %s170_s7  }
  0x26   :  { %s136_s10 = scalar_lea.vmem %s202_s26, 768  ;;  %p141_p3 = scmp.lt.s32.totalorder %s202_s26, %s202_s26 }
  0x27   :  { %p137_p2 = scmp.ne.s32.totalorder %s202_s26, %s136_s10  ;;  %p142_p4 = scmp.lt.s32.totalorder %s136_s10, %s136_s10 }
  0x29   :  { %p143_p5 = por %p142_p4, %p141_p3 }
  0x2b   :  { %p144_p6 = pnand %p143_p5, %p137_p2 }
  0x2d   :  { %147 = shalt.err (!%p144_p6)
}
  0x2e   :  { %s148_s13 = scalar_lea.hbm %s240_s2, 768 }
  0x2f   :  { %p149_p7 = scmp.ne.s32.totalorder %s240_s2, %s148_s13  ;;  %p152_p8 = scmp.lt.u32.totalorder %s148_s13, %s240_s2 }
  0x31   :  { %p154_p9 = pnand %p152_p8, %p149_p7 }
  0x33   :  { %157 = shalt.err (!%p154_p9)
}
  0x34   :  { %s171_s1 = smov 192   ;;  %s172_s18 = smov 12  }
  0x35   :  { %73 = dma.vmem_to_hbm [thread:$0]  %s202_s26, 768, %s240_s2, [#allocation7], %s171_s1, %s171_s1, %s172_s18  }
  0x36   :  { %160 = dma.done.wait [#allocation4], 512  }
  0x37   :  { %161 = vsyncadd [#allocation4], 4294966784 }
  0x38   :  { %162 = dma.done.wait [#allocation7], 768  }
  0x39   :  { %163 = vsyncadd [#allocation7], 4294966528 }
  0x3a   :  { %80 = vsyncpa [#allocation3], 1 }
  0x3b   :  { %81 = vsyncpa [#allocation4], 1 }
  0x3c   :  { %82 = vsyncpa [#allocation7], 1 }

</bundles_post_ra>
